<compile_context>
chip_gen: v7x
topology: tpu7x:2x2x1
jax: 0.10.0
libtpu: 0.0.40
codegen_flags: <defaults>
</compile_context>

<pallas_src>
import jax
import jax.numpy as jnp
from jax.experimental import pallas as pl
from jax.experimental.pallas import tpu as pltpu

N_HID = 32  # edge_dim = n_hid of CycleNet_edge


def _round_up(x, m):
    return ((x + m - 1) // m) * m


# ---------------------------------------------------------------------------
# Pallas kernel: SCB_encoder -> SCB_encoder2 (+ beta-sum) -> SCB_encoder4
# Processes Gb graphs per grid step.
# ---------------------------------------------------------------------------
def _scb_kernel(l1_ref, w1_ref, b1_ref, w2_ref, b2_ref,
                w3a_ref, w3b_ref, b3_ref, w4_ref, b4_ref,
                w5_ref, b5_ref, w6_ref, b6_ref,
                out_ref, base_sc, acc_sc):
    Gb, B, E, _ = l1_ref.shape

    # --- SCB_encoder on L1.sum(edges): Linear(1,64)->ReLU->Linear(64,64),
    #     then the h1 half of SCB_encoder2's Linear(65,128) (cat@W3 == h1@W3[:64] + L1*W3[64:65]).
    scb_flat = l1_ref[...].reshape(Gb * B, E, 1)          # leading-dim merge: layout-free
    l1sum = jnp.sum(scb_flat, axis=1)                     # (Gb*B, 1)  sum over edges
    h1 = jnp.maximum(l1sum * w1_ref[...] + b1_ref[...], 0.0)                           # (Gb*B, 64)
    h1 = jnp.dot(h1, w2_ref[...], preferred_element_type=jnp.float32) + b2_ref[...]    # (Gb*B, 64)
    base = jnp.dot(h1, w3a_ref[...], preferred_element_type=jnp.float32) + b3_ref[...]  # (Gb*B, 128)
    base_sc[...] = base.reshape(Gb, B, 128)

    # --- sum_b relu(base_b + |SCB|_b * w3b): accumulate over betas in a VMEM scratch,
    #     never materializing the (B, E, 128) tensor.
    acc_sc[...] = jnp.zeros_like(acc_sc)
    w3b = w3b_ref[...].reshape(1, 1, 128)                 # hoisted out of the loop

    @pl.loop(0, B)
    def _(b):
        base_b = base_sc[:, pl.ds(b, 1), :]                          # (Gb, 1, 128)
        scb_b = l1_ref[:, pl.ds(b, 1), :, :].reshape(Gb, E, 1)       # (Gb, E, 1)
        acc_sc[...] += jnp.maximum(base_b + scb_b * w3b, 0.0)        # (Gb, E, 128)

    # --- second Linear of SCB_encoder2: sum_b(relu_b @ W4 + b4) == (sum_b relu_b) @ W4 + B*b4
    #     then SCB_encoder4: Linear(128, n_hid)->ReLU->Linear(n_hid, n_hid)
    s = acc_sc[...].reshape(Gb * E, 128)                  # tile-aligned (E % 8 == 0)
    h2 = jnp.dot(s, w4_ref[...], preferred_element_type=jnp.float32) + b4_ref[...] * float(B)
    h3 = jnp.maximum(
        jnp.dot(h2, w5_ref[...], preferred_element_type=jnp.float32) + b5_ref[...], 0.0)
    out_ref[...] = jnp.dot(h3, w6_ref[...], preferred_element_type=jnp.float32) + b6_ref[...]


def scb_encode(l1_padded, params, graphs_per_step=None):
    """l1_padded: (G, max_beta, max_edge, 1) f32 -> (G, max_edge, N_HID) f32."""
    G, B, E, _ = l1_padded.shape
    E_pad = _round_up(max(E, 8), 8)

    if graphs_per_step is None:
        # target >=256 rows through the edge-path matmuls, capped by a per-step VMEM budget
        per_graph_bytes = 4 * (B * E_pad + B * 128 + E_pad * 128 + E_pad * N_HID)
        gb_mxu = pl.cdiv(256, E_pad)
        gb_vmem = max(1, (4 * 1024 * 1024) // max(per_graph_bytes, 1))
        graphs_per_step = max(1, min(G, gb_mxu, gb_vmem))
    Gb = int(graphs_per_step)
    G_pad = _round_up(G, Gb)

    l1 = l1_padded
    if E_pad != E or G_pad != G:
        l1 = jnp.pad(l1, ((0, G_pad - G), (0, 0), (0, E_pad - E), (0, 0)))

    def w_spec(arr):
        return pl.BlockSpec(arr.shape, lambda g, _nd=arr.ndim: (0,) * _nd)

    out_flat = pl.pallas_call(
        _scb_kernel,
        out_shape=jax.ShapeDtypeStruct((G_pad * E_pad, N_HID), jnp.float32),
        grid_spec=pltpu.PrefetchScalarGridSpec(
            num_scalar_prefetch=0,
            grid=(G_pad // Gb,),
            in_specs=[pl.BlockSpec((Gb, B, E_pad, 1), lambda g: (g, 0, 0, 0))]
                     + [w_spec(p) for p in params],
            out_specs=pl.BlockSpec((Gb * E_pad, N_HID), lambda g: (g, 0)),
            scratch_shapes=[pltpu.VMEM((Gb, B, 128), jnp.float32),
                            pltpu.VMEM((Gb, E_pad, 128), jnp.float32)],
        ),
        compiler_params=pltpu.CompilerParams(
            dimension_semantics=("parallel",),          # independent graph blocks -> 2 TCs on v7x
            vmem_limit_bytes=32 * 1024 * 1024,
        ),
    )(l1, *params)

    out = out_flat.reshape(G_pad, E_pad, N_HID)
    return out[:G, :E]                                   # drop layout padding (zero cols/graphs)


# ---------------------------------------------------------------------------
# Glue (padding, masking, line-graph construction) — plain JAX, host side
# ---------------------------------------------------------------------------
def pad_scb(x, edgelen, betalen):
    """JAX port of pad_SCB."""
    beta_i, e_i = x.shape
    mask = jnp.zeros((edgelen,), dtype=bool)
    if e_i < edgelen or beta_i < betalen:
        new_x = jnp.zeros((betalen, edgelen), x.dtype).at[:beta_i, :e_i].set(x)
        mask = mask.at[:e_i].set(True)
        x = new_x
    else:
        mask = jnp.ones((edgelen,), dtype=bool)
    return x[None], mask


def cyclenet_edge_forward(params, hodge_emb, edge_index, x, batch, graphs_per_step=None):
    # --- hodge embedding path (Pallas hot path) ---
    max_edge = max(he[1].shape[0] for he in hodge_emb)
    max_beta = max(he[2].shape[0] for he in hodge_emb)
    l1_list, masks = [], []
    for he in hodge_emb:
        scb = jnp.abs(he[2]).astype(x.dtype)
        pad_emb, pad_mask = pad_scb(scb, max_edge, max_beta)
        l1_list.append(pad_emb)
        masks.append(pad_mask)
    pad_masks = jnp.concatenate(masks)                        # (G*max_edge,)
    L1 = jnp.concatenate(l1_list, axis=0)[..., None]          # (G, max_beta, max_edge, 1)

    enc = scb_encode(L1, params, graphs_per_step=graphs_per_step)   # (G, max_edge, N_HID)
    L1_flat = enc.reshape(L1.shape[0] * max_edge, -1)         # (G*max_edge, N_HID)
    # TODO(synk): boolean-mask select is data-dependent-shape host glue (not jittable).
    L1_sel = L1_flat[pad_masks]                               # keep real (unpadded) edges

    # --- line-graph (edge adjacency) construction ---
    E_tot = edge_index.shape[1]
    N_tot = x.shape[0]
    ar = jnp.arange(E_tot)
    Bmat = jnp.zeros((E_tot, N_tot), jnp.float32)
    Bmat = Bmat.at[ar, edge_index[0]].add(1.0)
    Bmat = Bmat.at[ar, edge_index[1]].add(1.0)
    new_edge_index = jnp.stack(jnp.nonzero(Bmat @ Bmat.T))    # (2, nnz)
    edge_batch = batch[edge_index[0]]

    # TODO(synk): GNN_edge is not defined in the provided reference; return its inputs.
    return L1_sel, new_edge_index, edge_batch


# ---------------------------------------------------------------------------
# Pure-JAX reference of the SCB encoder stack (mirrors the torch ops verbatim)
# ---------------------------------------------------------------------------
def scb_encode_ref(l1_padded, params):
    w1, b1, w2, b2, w3a, w3b, b3, w4, b4, w5, b5, w6, b6 = params
    L1_t = jnp.transpose(l1_padded, (0, 2, 1, 3))             # (G, E, B, 1)
    G, E, B, _ = L1_t.shape
    l1sum = L1_t.sum(axis=1)                                  # (G, B, 1)
    h1 = jnp.maximum(l1sum @ w1 + b1, 0.0) @ w2 + b2          # (G, B, 64)
    h1e = jnp.broadcast_to(h1[:, None], (G, E, B, 64))
    xcat = jnp.concatenate([h1e, L1_t], axis=-1)              # (G, E, B, 65)
    w3 = jnp.concatenate([w3a, w3b], axis=0)
    h2 = (jnp.maximum(xcat @ w3 + b3, 0.0) @ w4 + b4).sum(axis=2)   # (G, E, 128)
    return jnp.maximum(h2 @ w5 + b5, 0.0) @ w6 + b6           # (G, E, N_HID)


def _linear_params(key, fan_in, fan_out):
    kw, kb = jax.random.split(key)
    bound = float(fan_in) ** -0.5
    w = jax.random.uniform(kw, (fan_in, fan_out), jnp.float32, -bound, bound)
    b = jax.random.uniform(kb, (1, fan_out), jnp.float32, -bound, bound)
    return w, b


if __name__ == "__main__":
    key = jax.random.PRNGKey(0)
    keys = jax.random.split(key, 20)

    node_feat = 3  # GNN hyperparams (edge_feat, n_out, nl_gnn) unused: GNN_edge not provided

    # deterministic SCB encoder parameters
    w1, b1 = _linear_params(keys[0], 1, 64)
    w2, b2 = _linear_params(keys[1], 64, 64)
    w3, b3 = _linear_params(keys[2], 65, 128)
    w3a, w3b = w3[:64], w3[64:65]
    w4, b4 = _linear_params(keys[3], 128, 128)
    w5, b5 = _linear_params(keys[4], 128, N_HID)
    w6, b6 = _linear_params(keys[5], N_HID, N_HID)
    params = (w1, b1, w2, b2, w3a, w3b, b3, w4, b4, w5, b5, w6, b6)

    # synthetic batched graph data: 3 graphs (exercises graph batching + padding to Gb)
    n_graphs = 3
    n_nodes = [5, 6, 4]
    n_edges = [12, 14, 10]
    n_betas = [4, 6, 3]
    node_off = [0]
    for n in n_nodes[:-1]:
        node_off.append(node_off[-1] + n)

    ei_parts, hodge_emb = [], []
    k_idx = 6
    for gi in range(n_graphs):
        src = jax.random.randint(keys[k_idx], (n_edges[gi],), 0, n_nodes[gi]) + node_off[gi]
        k_idx += 1
        dst = jax.random.randint(keys[k_idx], (n_edges[gi],), 0, n_nodes[gi]) + node_off[gi]
        k_idx += 1
        ei_parts.append(jnp.stack([src, dst]))
        # hodge_emb[i] = (unused, per-edge tensor (only .shape[0] used), SCB dense (beta_i, e_i))
        scb = jax.random.normal(keys[k_idx], (n_betas[gi], n_edges[gi]), jnp.float32)
        k_idx += 1
        hodge_emb.append((None, jnp.zeros((n_edges[gi], 2), jnp.int32), scb))
    edge_index = jnp.concatenate(ei_parts, axis=1)                      # (2, 36)
    x = jax.random.normal(keys[k_idx], (sum(n_nodes), node_feat), jnp.float32)
    batch = jnp.concatenate([jnp.full((n_nodes[g],), g, jnp.int32) for g in range(n_graphs)])

    # graphs_per_step=2 -> grid of 2 steps with Gb=2 graphs/step (one padded graph),
    # exercising multi-step pipelining + graph/edge padding paths.
    L1_sel, new_edge_index, edge_batch = cyclenet_edge_forward(
        params, hodge_emb, edge_index, x, batch, graphs_per_step=2)
    jax.block_until_ready(L1_sel)

    # verify the Pallas hot path against the pure-JAX reference
    max_edge, max_beta = max(n_edges), max(n_betas)
    L1_pad = jnp.concatenate(
        [pad_scb(jnp.abs(he[2]), max_edge, max_beta)[0] for he in hodge_emb], axis=0)[..., None]
    ref = scb_encode_ref(L1_pad, params)
    got = scb_encode(L1_pad, params, graphs_per_step=2)
    jax.block_until_ready(got)
    assert got.shape == (n_graphs, max_edge, N_HID)
    err = float(jnp.max(jnp.abs(ref - got)))
    assert jnp.allclose(ref, got, atol=1e-3, rtol=1e-3), err
    assert L1_sel.shape == (sum(n_edges), N_HID)

    print("KERNEL_OK")
</pallas_src>

<mosaic_0001>
module attributes {stable_mosaic.version = 11 : i64} {
  func.func @_scb_kernel(%arg0: i32, %arg1: memref<2x6x16x1xf32, #tpu.memory_space<vmem>>, %arg2: memref<1x64xf32, #tpu.memory_space<vmem>>, %arg3: memref<1x64xf32, #tpu.memory_space<vmem>>, %arg4: memref<64x64xf32, #tpu.memory_space<vmem>>, %arg5: memref<1x64xf32, #tpu.memory_space<vmem>>, %arg6: memref<64x128xf32, #tpu.memory_space<vmem>>, %arg7: memref<1x128xf32, #tpu.memory_space<vmem>>, %arg8: memref<1x128xf32, #tpu.memory_space<vmem>>, %arg9: memref<128x128xf32, #tpu.memory_space<vmem>>, %arg10: memref<1x128xf32, #tpu.memory_space<vmem>>, %arg11: memref<128x32xf32, #tpu.memory_space<vmem>>, %arg12: memref<1x32xf32, #tpu.memory_space<vmem>>, %arg13: memref<32x32xf32, #tpu.memory_space<vmem>>, %arg14: memref<1x32xf32, #tpu.memory_space<vmem>>, %arg15: memref<32x32xf32, #tpu.memory_space<vmem>>, %arg16: memref<2x6x128xf32, #tpu.memory_space<vmem>>, %arg17: memref<2x16x128xf32, #tpu.memory_space<vmem>>) attributes {dimension_semantics = [#tpu.dimension_semantics<parallel>], iteration_bounds = array<i64: 2>, scalar_prefetch = 0 : i64, scratch_operands = 2 : i64, tpu.core_type = #tpu.core_type<tc>, window_params = [{transform_indices = @transform_0, window_bounds = array<i64: 2, 6, 16, 1>}, {pipeline_mode = #tpu.pipeline_mode<synchronous>, transform_indices = @transform_1, window_bounds = array<i64: 1, 64>}, {pipeline_mode = #tpu.pipeline_mode<synchronous>, transform_indices = @transform_2, window_bounds = array<i64: 1, 64>}, {pipeline_mode = #tpu.pipeline_mode<synchronous>, transform_indices = @transform_3, window_bounds = array<i64: 64, 64>}, {pipeline_mode = #tpu.pipeline_mode<synchronous>, transform_indices = @transform_4, window_bounds = array<i64: 1, 64>}, {pipeline_mode = #tpu.pipeline_mode<synchronous>, transform_indices = @transform_5, window_bounds = array<i64: 64, 128>}, {pipeline_mode = #tpu.pipeline_mode<synchronous>, transform_indices = @transform_6, window_bounds = array<i64: 1, 128>}, {pipeline_mode = #tpu.pipeline_mode<synchronous>, transform_indices = @transform_7, window_bounds = array<i64: 1, 128>}, {pipeline_mode = #tpu.pipeline_mode<synchronous>, transform_indices = @transform_8, window_bounds = array<i64: 128, 128>}, {pipeline_mode = #tpu.pipeline_mode<synchronous>, transform_indices = @transform_9, window_bounds = array<i64: 1, 128>}, {pipeline_mode = #tpu.pipeline_mode<synchronous>, transform_indices = @transform_10, window_bounds = array<i64: 128, 32>}, {pipeline_mode = #tpu.pipeline_mode<synchronous>, transform_indices = @transform_11, window_bounds = array<i64: 1, 32>}, {pipeline_mode = #tpu.pipeline_mode<synchronous>, transform_indices = @transform_12, window_bounds = array<i64: 32, 32>}, {pipeline_mode = #tpu.pipeline_mode<synchronous>, transform_indices = @transform_13, window_bounds = array<i64: 1, 32>}, {transform_indices = @transform_14, window_bounds = array<i64: 32, 32>}]} {
    %c0 = arith.constant 0 : index
    %c0_0 = arith.constant 0 : index
    %c0_1 = arith.constant 0 : index
    %c0_2 = arith.constant 0 : index
    %0 = vector.load %arg1[%c0, %c0_0, %c0_1, %c0_2] : memref<2x6x16x1xf32, #tpu.memory_space<vmem>>, vector<2x6x16x1xf32>
    %1 = vector.shape_cast %0 : vector<2x6x16x1xf32> to vector<12x16x1xf32>
    %cst = arith.constant dense<0.000000e+00> : vector<12x1xf32>
    %2 = vector.multi_reduction <add>, %1, %cst [1] : vector<12x16x1xf32> to vector<12x1xf32>
    %c0_3 = arith.constant 0 : index
    %c0_4 = arith.constant 0 : index
    %3 = vector.load %arg2[%c0_3, %c0_4] : memref<1x64xf32, #tpu.memory_space<vmem>>, vector<1x64xf32>
    %4 = vector.broadcast %2 : vector<12x1xf32> to vector<12x64xf32>
    %5 = vector.broadcast %3 : vector<1x64xf32> to vector<12x64xf32>
    %6 = arith.mulf %4, %5 : vector<12x64xf32>
    %c0_5 = arith.constant 0 : index
    %c0_6 = arith.constant 0 : index
    %7 = vector.load %arg3[%c0_5, %c0_6] : memref<1x64xf32, #tpu.memory_space<vmem>>, vector<1x64xf32>
    %8 = vector.broadcast %7 : vector<1x64xf32> to vector<12x64xf32>
    %9 = arith.addf %6, %8 : vector<12x64xf32>
    %cst_7 = arith.constant 0.000000e+00 : f32
    %10 = vector.broadcast %cst_7 : f32 to vector<12x64xf32>
    %11 = arith.maximumf %9, %10 : vector<12x64xf32>
    %c0_8 = arith.constant 0 : index
    %c0_9 = arith.constant 0 : index
    %12 = vector.load %arg4[%c0_8, %c0_9] : memref<64x64xf32, #tpu.memory_space<vmem>>, vector<64x64xf32>
    %cst_10 = arith.constant dense<0.000000e+00> : vector<12x64xf32>
    %13 = tpu.matmul %11, %12, %cst_10 {dimension_numbers = #tpu.dot_dimension_numbers<[1], [0], [0], [1], [0, 0, 1, 1], [], []>} : vector<12x64xf32>, vector<64x64xf32>, vector<12x64xf32> -> vector<12x64xf32>
    %c0_11 = arith.constant 0 : index
    %c0_12 = arith.constant 0 : index
    %14 = vector.load %arg5[%c0_11, %c0_12] : memref<1x64xf32, #tpu.memory_space<vmem>>, vector<1x64xf32>
    %15 = vector.broadcast %14 : vector<1x64xf32> to vector<12x64xf32>
    %16 = arith.addf %13, %15 : vector<12x64xf32>
    %c0_13 = arith.constant 0 : index
    %c0_14 = arith.constant 0 : index
    %17 = vector.load %arg6[%c0_13, %c0_14] : memref<64x128xf32, #tpu.memory_space<vmem>>, vector<64x128xf32>
    %cst_15 = arith.constant dense<0.000000e+00> : vector<12x128xf32>
    %18 = tpu.matmul %16, %17, %cst_15 {dimension_numbers = #tpu.dot_dimension_numbers<[1], [0], [0], [1], [0, 0, 1, 1], [], []>} : vector<12x64xf32>, vector<64x128xf32>, vector<12x128xf32> -> vector<12x128xf32>
    %c0_16 = arith.constant 0 : index
    %c0_17 = arith.constant 0 : index
    %19 = vector.load %arg8[%c0_16, %c0_17] : memref<1x128xf32, #tpu.memory_space<vmem>>, vector<1x128xf32>
    %20 = vector.broadcast %19 : vector<1x128xf32> to vector<12x128xf32>
    %21 = arith.addf %18, %20 : vector<12x128xf32>
    %22 = vector.shape_cast %21 : vector<12x128xf32> to vector<2x6x128xf32>
    %c0_18 = arith.constant 0 : index
    %c0_19 = arith.constant 0 : index
    %c0_20 = arith.constant 0 : index
    %23 = vector.load %arg16[%c0_18, %c0_19, %c0_20] : memref<2x6x128xf32, #tpu.memory_space<vmem>>, vector<2x6x128xf32>
    tpu.vector_store %arg16[%c0_18, %c0_19, %c0_20], %22 {strides = array<i32>} : memref<2x6x128xf32, #tpu.memory_space<vmem>>, vector<2x6x128xf32>,
    %cst_21 = arith.constant 0.000000e+00 : f32
    %24 = vector.broadcast %cst_21 : f32 to vector<2x16x128xf32>
    %c0_22 = arith.constant 0 : index
    %c0_23 = arith.constant 0 : index
    %c0_24 = arith.constant 0 : index
    %25 = vector.load %arg17[%c0_22, %c0_23, %c0_24] : memref<2x16x128xf32, #tpu.memory_space<vmem>>, vector<2x16x128xf32>
    tpu.vector_store %arg17[%c0_22, %c0_23, %c0_24], %24 {strides = array<i32>} : memref<2x16x128xf32, #tpu.memory_space<vmem>>, vector<2x16x128xf32>,
    %c0_25 = arith.constant 0 : index
    %c0_26 = arith.constant 0 : index
    %26 = vector.load %arg7[%c0_25, %c0_26] : memref<1x128xf32, #tpu.memory_space<vmem>>, vector<1x128xf32>
    %27 = vector.shape_cast %26 : vector<1x128xf32> to vector<1x1x128xf32>
    %c0_i32 = arith.constant 0 : i32
    %c6_i32 = arith.constant 6 : i32
    %28 = arith.addi %c0_i32, %c6_i32 : i32
    %c1_i32 = arith.constant 1 : i32
    scf.for %arg18 = %c0_i32 to %28 step %c1_i32  : i32 {
      %c1_i32_50 = arith.constant 1 : i32
      %51 = arith.muli %arg18, %c1_i32_50 : i32
      %c0_i32_51 = arith.constant 0 : i32
      %52 = arith.addi %c0_i32_51, %51 : i32
      %c0_52 = arith.constant 0 : index
      %53 = arith.index_cast %52 : i32 to index
      %c0_53 = arith.constant 0 : index
      %54 = vector.load %arg16[%c0_52, %53, %c0_53] : memref<2x6x128xf32, #tpu.memory_space<vmem>>, vector<2x1x128xf32>
      %c0_54 = arith.constant 0 : index
      %55 = arith.index_cast %52 : i32 to index
      %c0_55 = arith.constant 0 : index
      %c0_56 = arith.constant 0 : index
      %56 = vector.load %arg1[%c0_54, %55, %c0_55, %c0_56] : memref<2x6x16x1xf32, #tpu.memory_space<vmem>>, vector<2x1x16x1xf32>
      %57 = vector.shape_cast %56 : vector<2x1x16x1xf32> to vector<2x16x1xf32>
      %c0_57 = arith.constant 0 : index
      %c0_58 = arith.constant 0 : index
      %c0_59 = arith.constant 0 : index
      %58 = vector.load %arg17[%c0_57, %c0_58, %c0_59] : memref<2x16x128xf32, #tpu.memory_space<vmem>>, vector<2x16x128xf32>
      %59 = vector.broadcast %57 : vector<2x16x1xf32> to vector<2x16x128xf32>
      %60 = vector.broadcast %27 : vector<1x1x128xf32> to vector<2x16x128xf32>
      %61 = arith.mulf %59, %60 : vector<2x16x128xf32>
      %62 = vector.broadcast %54 : vector<2x1x128xf32> to vector<2x16x128xf32>
      %63 = arith.addf %62, %61 : vector<2x16x128xf32>
      %cst_60 = arith.constant 0.000000e+00 : f32
      %64 = vector.broadcast %cst_60 : f32 to vector<2x16x128xf32>
      %65 = arith.maximumf %63, %64 : vector<2x16x128xf32>
      %66 = arith.addf %58, %65 : vector<2x16x128xf32>
      %c0_61 = arith.constant 0 : index
      %c0_62 = arith.constant 0 : index
      %c0_63 = arith.constant 0 : index
      %67 = vector.load %arg17[%c0_61, %c0_62, %c0_63] : memref<2x16x128xf32, #tpu.memory_space<vmem>>, vector<2x16x128xf32>
      tpu.vector_store %arg17[%c0_61, %c0_62, %c0_63], %66 {strides = array<i32>} : memref<2x16x128xf32, #tpu.memory_space<vmem>>, vector<2x16x128xf32>,
    }
    %c6_i32_27 = arith.constant 6 : i32
    %c0_28 = arith.constant 0 : index
    %c0_29 = arith.constant 0 : index
    %c0_30 = arith.constant 0 : index
    %29 = vector.load %arg17[%c0_28, %c0_29, %c0_30] : memref<2x16x128xf32, #tpu.memory_space<vmem>>, vector<2x16x128xf32>
    %30 = vector.shape_cast %29 : vector<2x16x128xf32> to vector<32x128xf32>
    %c0_31 = arith.constant 0 : index
    %c0_32 = arith.constant 0 : index
    %31 = vector.load %arg9[%c0_31, %c0_32] : memref<128x128xf32, #tpu.memory_space<vmem>>, vector<128x128xf32>
    %cst_33 = arith.constant dense<0.000000e+00> : vector<32x128xf32>
    %32 = tpu.matmul %30, %31, %cst_33 {dimension_numbers = #tpu.dot_dimension_numbers<[1], [0], [0], [1], [0, 0, 1, 1], [], []>} : vector<32x128xf32>, vector<128x128xf32>, vector<32x128xf32> -> vector<32x128xf32>
    %c0_34 = arith.constant 0 : index
    %c0_35 = arith.constant 0 : index
    %33 = vector.load %arg10[%c0_34, %c0_35] : memref<1x128xf32, #tpu.memory_space<vmem>>, vector<1x128xf32>
    %cst_36 = arith.constant 6.000000e+00 : f32
    %34 = vector.broadcast %cst_36 : f32 to vector<1x128xf32>
    %35 = arith.mulf %33, %34 : vector<1x128xf32>
    %36 = vector.broadcast %35 : vector<1x128xf32> to vector<32x128xf32>
    %37 = arith.addf %32, %36 : vector<32x128xf32>
    %c0_37 = arith.constant 0 : index
    %c0_38 = arith.constant 0 : index
    %38 = vector.load %arg11[%c0_37, %c0_38] : memref<128x32xf32, #tpu.memory_space<vmem>>, vector<128x32xf32>
    %cst_39 = arith.constant dense<0.000000e+00> : vector<32x32xf32>
    %39 = tpu.matmul %37, %38, %cst_39 {dimension_numbers = #tpu.dot_dimension_numbers<[1], [0], [0], [1], [0, 0, 1, 1], [], []>} : vector<32x128xf32>, vector<128x32xf32>, vector<32x32xf32> -> vector<32x32xf32>
    %c0_40 = arith.constant 0 : index
    %c0_41 = arith.constant 0 : index
    %40 = vector.load %arg12[%c0_40, %c0_41] : memref<1x32xf32, #tpu.memory_space<vmem>>, vector<1x32xf32>
    %41 = vector.broadcast %40 : vector<1x32xf32> to vector<32x32xf32>
    %42 = arith.addf %39, %41 : vector<32x32xf32>
    %cst_42 = arith.constant 0.000000e+00 : f32
    %43 = vector.broadcast %cst_42 : f32 to vector<32x32xf32>
    %44 = arith.maximumf %42, %43 : vector<32x32xf32>
    %c0_43 = arith.constant 0 : index
    %c0_44 = arith.constant 0 : index
    %45 = vector.load %arg13[%c0_43, %c0_44] : memref<32x32xf32, #tpu.memory_space<vmem>>, vector<32x32xf32>
    %cst_45 = arith.constant dense<0.000000e+00> : vector<32x32xf32>
    %46 = tpu.matmul %44, %45, %cst_45 {dimension_numbers = #tpu.dot_dimension_numbers<[1], [0], [0], [1], [0, 0, 1, 1], [], []>} : vector<32x32xf32>, vector<32x32xf32>, vector<32x32xf32> -> vector<32x32xf32>
    %c0_46 = arith.constant 0 : index
    %c0_47 = arith.constant 0 : index
    %47 = vector.load %arg14[%c0_46, %c0_47] : memref<1x32xf32, #tpu.memory_space<vmem>>, vector<1x32xf32>
    %48 = vector.broadcast %47 : vector<1x32xf32> to vector<32x32xf32>
    %49 = arith.addf %46, %48 : vector<32x32xf32>
    %c0_48 = arith.constant 0 : index
    %c0_49 = arith.constant 0 : index
    %50 = vector.load %arg15[%c0_48, %c0_49] : memref<32x32xf32, #tpu.memory_space<vmem>>, vector<32x32xf32>
    tpu.vector_store %arg15[%c0_48, %c0_49], %49 {strides = array<i32>} : memref<32x32xf32, #tpu.memory_space<vmem>>, vector<32x32xf32>,
    return
  }
  func.func @transform_0(%arg0: i32) -> (i32, i32, i32, i32) {
    %c0_i32 = arith.constant 0 : i32
    %c0_i32_0 = arith.constant 0 : i32
    %c0_i32_1 = arith.constant 0 : i32
    %c0_i32_2 = arith.constant 0 : i32
    return %arg0, %c0_i32, %c0_i32_0, %c0_i32_1 : i32, i32, i32, i32
  }
  func.func @transform_1(%arg0: i32) -> (i32, i32) {
    %c0_i32 = arith.constant 0 : i32
    %c0_i32_0 = arith.constant 0 : i32
    %c0_i32_1 = arith.constant 0 : i32
    return %c0_i32, %c0_i32_0 : i32, i32
  }
  func.func @transform_2(%arg0: i32) -> (i32, i32) {
    %c0_i32 = arith.constant 0 : i32
    %c0_i32_0 = arith.constant 0 : i32
    %c0_i32_1 = arith.constant 0 : i32
    return %c0_i32, %c0_i32_0 : i32, i32
  }
  func.func @transform_3(%arg0: i32) -> (i32, i32) {
    %c0_i32 = arith.constant 0 : i32
    %c0_i32_0 = arith.constant 0 : i32
    %c0_i32_1 = arith.constant 0 : i32
    return %c0_i32, %c0_i32_0 : i32, i32
  }
  func.func @transform_4(%arg0: i32) -> (i32, i32) {
    %c0_i32 = arith.constant 0 : i32
    %c0_i32_0 = arith.constant 0 : i32
    %c0_i32_1 = arith.constant 0 : i32
    return %c0_i32, %c0_i32_0 : i32, i32
  }
  func.func @transform_5(%arg0: i32) -> (i32, i32) {
    %c0_i32 = arith.constant 0 : i32
    %c0_i32_0 = arith.constant 0 : i32
    %c0_i32_1 = arith.constant 0 : i32
    return %c0_i32, %c0_i32_0 : i32, i32
  }
  func.func @transform_6(%arg0: i32) -> (i32, i32) {
    %c0_i32 = arith.constant 0 : i32
    %c0_i32_0 = arith.constant 0 : i32
    %c0_i32_1 = arith.constant 0 : i32
    return %c0_i32, %c0_i32_0 : i32, i32
  }
  func.func @transform_7(%arg0: i32) -> (i32, i32) {
    %c0_i32 = arith.constant 0 : i32
    %c0_i32_0 = arith.constant 0 : i32
    %c0_i32_1 = arith.constant 0 : i32
    return %c0_i32, %c0_i32_0 : i32, i32
  }
  func.func @transform_8(%arg0: i32) -> (i32, i32) {
    %c0_i32 = arith.constant 0 : i32
    %c0_i32_0 = arith.constant 0 : i32
    %c0_i32_1 = arith.constant 0 : i32
    return %c0_i32, %c0_i32_0 : i32, i32
  }
  func.func @transform_9(%arg0: i32) -> (i32, i32) {
    %c0_i32 = arith.constant 0 : i32
    %c0_i32_0 = arith.constant 0 : i32
    %c0_i32_1 = arith.constant 0 : i32
    return %c0_i32, %c0_i32_0 : i32, i32
  }
  func.func @transform_10(%arg0: i32) -> (i32, i32) {
    %c0_i32 = arith.constant 0 : i32
    %c0_i32_0 = arith.constant 0 : i32
    %c0_i32_1 = arith.constant 0 : i32
    return %c0_i32, %c0_i32_0 : i32, i32
  }
  func.func @transform_11(%arg0: i32) -> (i32, i32) {
    %c0_i32 = arith.constant 0 : i32
    %c0_i32_0 = arith.constant 0 : i32
    %c0_i32_1 = arith.constant 0 : i32
    return %c0_i32, %c0_i32_0 : i32, i32
  }
  func.func @transform_12(%arg0: i32) -> (i32, i32) {
    %c0_i32 = arith.constant 0 : i32
    %c0_i32_0 = arith.constant 0 : i32
    %c0_i32_1 = arith.constant 0 : i32
    return %c0_i32, %c0_i32_0 : i32, i32
  }
  func.func @transform_13(%arg0: i32) -> (i32, i32) {
    %c0_i32 = arith.constant 0 : i32
    %c0_i32_0 = arith.constant 0 : i32
    %c0_i32_1 = arith.constant 0 : i32
    return %c0_i32, %c0_i32_0 : i32, i32
  }
  func.func @transform_14(%arg0: i32) -> (i32, i32) {
    %c0_i32 = arith.constant 0 : i32
    %c0_i32_0 = arith.constant 0 : i32
    return %arg0, %c0_i32 : i32, i32
  }
}

</mosaic_0001>

<bundles_post_ra>
// kernel: tpu_custom_call.1
= control target key start
LH: loop header
LB: loop body
LE: loop exit
PB: predicated region body
PF: predicated region fallthrough
CT: control target
= control target key end

     0   :  { %s1943_s29 = smov 0   ;;  %s2253_s0 = inlined_call_operand.vmem [shape: f32[4,6,16,1], index: 0, kind: input, shape index: {}]   ;;  %s2254_s1 = inlined_call_operand.vmem [shape: f32[1,64], index: 1, kind: input, shape index: {}]   ;;  %s2255_s2 = inlined_call_operand.vmem [shape: f32[1,64], index: 2, kind: input, shape index: {}]   ;;  %s2256_s3 = inlined_call_operand.vmem [shape: f32[64,64], index: 3, kind: input, shape index: {}]   ;;  %s2257_s4 = inlined_call_operand.vmem [shape: f32[1,64], index: 4, kind: input, shape index: {}]   ;;  %s2258_s5 = inlined_call_operand.vmem [shape: f32[64,128], index: 5, kind: input, shape index: {}]   ;;  %s2259_s6 = inlined_call_operand.vmem [shape: f32[1,128], index: 6, kind: input, shape index: {}]   ;;  %s2260_s7 = inlined_call_operand.vmem [shape: f32[1,128], index: 7, kind: input, shape index: {}]   ;;  %s2261_s8 = inlined_call_operand.vmem [shape: f32[128,128], index: 8, kind: input, shape index: {}]   ;;  %s2262_s9 = inlined_call_operand.vmem [shape: f32[1,128], index: 9, kind: input, shape index: {}]   ;;  %s2263_s10 = inlined_call_operand.vmem [shape: f32[128,32], index: 10, kind: input, shape index: {}]   ;;  %s2264_s11 = inlined_call_operand.vmem [shape: f32[1,32], index: 11, kind: input, shape index: {}]   ;;  %s2265_s12 = inlined_call_operand.vmem [shape: f32[32,32], index: 12, kind: input, shape index: {}]   ;;  %s2266_s13 = inlined_call_operand.vmem [shape: f32[1,32], index: 13, kind: input, shape index: {}]   ;;  %s2267_s14 = inlined_call_operand.vmem [shape: f32[64,32], index: 14, kind: output, shape index: {}]  }
   0x1 LB: > { %s1490_s30 = sadd.s32 4294967295, %s1858_s29   ;;  %p1494_p0 = scmp.ge.s32.totalorder %s1858_s29, 1  ;;  %s1858_s29 = sphi %s1943_s29, %s24_s29  }
   0x2   : > { %p414_p1 = scmp.lt.s32.totalorder %s1858_s29, 3 }
   0x4   : > { %p415_p2 = pnand %p1494_p0, %p414_p1 }
   0x5   : > { %s1495_s15 = sshll.u32 (!%p415_p2), %s1490_s30, 1  ;;  %v1864_v0 = vmov (!%p415_p2), 0   ;;  %vm498_vm0 = vcmask (!%p415_p2), 7168   ;;  %s1497_s28 = sshll.u32 (!%p415_p2), %s1490_s30, 2  ;;  %vm745_vm1 = vcmask (!%p415_p2), 1041409   ;;  %vm748_vm2 = vcmask (!%p415_p2), 1042434  }
   0x6   : > { %418 = sbr.rel (%p415_p2) target bundleno = 1452 (0x5ac), region = 76  ;;  %1845 = vset.pattern.permute.xlu1 (!%p415_p2), %v1864_v0  ;;  %1844 = vset.pattern.permute.xlu0 (!%p415_p2), %v1864_v0  ;;  %p462_p3 = scmp.lt.s32.totalorder (!%p415_p2), %s1495_s15, 3  ;;  %vm751_vm3 = vcmask (!%p415_p2), 1043459   ;;  %vm754_vm4 = vcmask (!%p415_p2), 1044484   ;;  %vm757_vm5 = vcmask (!%p415_p2), 1045509   ;;  %vm760_vm6 = vcmask (!%p415_p2), 1046534  }
   0x7   : > { %p469_p4 = scmp.lt.s32.totalorder (!%p415_p2), %s1497_s28, 7  ;;  %vm763_vm7 = vcmask (!%p415_p2), 1047559   ;;  %vm771_vm8 = vcmask (!%p415_p2), 523264   ;;  %s2105_s27 = smov (!%p415_p2), 0  }
   0xd   : > { %s2269_s15 = smov (!%p462_p3, %s1495_s15), 3  ;;  %s2271_s28 = smov (!%p469_p4, %s1497_s28), 7 }
   0xe   : > { %s1823_s16 = smul.u32 96, %s2269_s15  ;;  %s1498_s23 = sshll.u32 %s2271_s28, 3 }
   0xf   : > { %s2035_s26 = scalar_lea.vmem %s2267_s14, %s1498_s23 }
  0x10   : > { %s1956_s19 = scalar_lea.vmem %s2253_s0, %s1823_s16 }
  0x11   : > { %v476_v1 = vld [vmem:[%s1956_s19 + $0x10] sm:$0xff]  ;;  %v477_v2 = vld [vmem:[%s1956_s19 + $0x18] sm:$0xff]  ;;  %v474_v3 = vld [vmem:[%s1956_s19] sm:$0xff] }
  0x12   : > { %v508_v4 = vsel %vm498_vm0, %v476_v1, 0.0  ;;  %v509_v5 = vsel %vm498_vm0, %v477_v2, 0.0  ;;  %v475_v6 = vld [vmem:[%s1956_s19 + $0x8] sm:$0xff]  ;;  %v499_v7 = vsel %vm498_vm0, %v474_v3, 0.0  ;;  %v478_v8 = vld [vmem:[%s1956_s19 + $0x20] sm:$0xff]  ;;  %v480_v14 = vld [vmem:[%s1956_s19 + $0x30] sm:$0xff] }
  0x13   : > { %v479_v9 = vld [vmem:[%s1956_s19 + $0x28] sm:$0xff]  ;;  %v510_v10 = vadd.f32 %v509_v5, %v508_v4  ;;  %v500_v11 = vsel %vm498_vm0, %v475_v6, 0.0  ;;  %v517_v12 = vsel %vm498_vm0, %v478_v8, 0.0  ;;  %v481_v15 = vld [vmem:[%s1956_s19 + $0x38] sm:$0xff]  ;;  %v482_v16 = vld [vmem:[%s1956_s19 + $0x40] sm:$0xff]  ;;  %v526_v19 = vsel %vm498_vm0, %v480_v14, 0.0 }
  0x14   : > { %v518_v13 = vsel %vm498_vm0, %v479_v9, 0.0  ;;  %v501_v17 = vadd.f32 %v500_v11, %v499_v7  ;;  %v527_v20 = vsel %vm498_vm0, %v481_v15, 0.0  ;;  %v483_v21 = vld [vmem:[%s1956_s19 + $0x48] sm:$0xff]  ;;  %v484_v22 = vld [vmem:[%s1956_s19 + $0x50] sm:$0xff]  ;;  %v485_v23 = vld [vmem:[%s1956_s19 + $0x58] sm:$0xff]  ;;  %v535_v26 = vsel %vm498_vm0, %v482_v16, 0.0 }
  0x15   : > { %v519_v18 = vadd.f32 %v518_v13, %v517_v12  ;;  %v511_v24 = vrot.slane %v510_v10, 4  ;;  %v528_v25 = vadd.f32 %v527_v20, %v526_v19  ;;  %v536_v27 = vsel %vm498_vm0, %v483_v21, 0.0  ;;  %v486_v28 = vld [vmem:[%s1956_s19 + $0x60] sm:$0xff]  ;;  %v487_v33 = vld [vmem:[%s1956_s19 + $0x68] sm:$0xff]  ;;  %v492_v34 = vld [vmem:[%s1956_s19 + $0x90] sm:$0xff] }
  0x16   : > { %v502_v29 = vrot.slane %v501_v17, 4  ;;  %v537_v31 = vadd.f32 %v536_v27, %v535_v26  ;;  %v544_v32 = vsel %vm498_vm0, %v484_v22, 0.0  ;;  %v545_v37 = vsel %vm498_vm0, %v485_v23, 0.0  ;;  %v493_v43 = vld [vmem:[%s1956_s19 + $0x98] sm:$0xff]  ;;  %v488_v4 = vld [vmem:[%s1956_s19 + $0x70] sm:$0xff]  ;;  %v495_v14 = vld [vmem:[%s1956_s19 + $0xa8] sm:$0xff] }
  0x17   : > { %v520_v30 = vrot.slane %v519_v18, 4  ;;  %v512_v35 = vadd.f32 %v511_v24, %v510_v10  ;;  %v529_v36 = vrot.slane %v528_v25, 4  ;;  %v553_v38 = vsel %vm498_vm0, %v486_v28, 0.0  ;;  %v489_v9 = vld [vmem:[%s1956_s19 + $0x78] sm:$0xff]  ;;  %v494_v10 = vld [vmem:[%s1956_s19 + $0xa0] sm:$0xff]  ;;  %v491_v20 = vld [vmem:[%s1956_s19 + $0x88] sm:$0xff] }
  0x18   : > { %v503_v39 = vadd.f32 %v502_v29, %v501_v17  ;;  %v538_v41 = vrot.slane %v537_v31, 4  ;;  %v546_v42 = vadd.f32 %v545_v37, %v544_v32  ;;  %v554_v46 = vsel %vm498_vm0, %v487_v33, 0.0  ;;  %v490_v19 = vld [vmem:[%s1956_s19 + $0x80] sm:$0xff]  ;;  %v496_v29 = vld [vmem:[%s1956_s19 + $0xb0] sm:$0xff] }
  0x19   : > { %v521_v40 = vadd.f32 %v520_v30, %v519_v18  ;;  %v513_v44 = vrot.slane %v512_v35, 2  ;;  %v530_v45 = vadd.f32 %v529_v36, %v528_v25  ;;  %v580_v47 = vsel %vm498_vm0, %v492_v34, 0.0  ;;  %v497_v30 = vld [vmem:[%s1956_s19 + $0xb8] sm:$0xff] }
  0x1a   : > { %v504_v48 = vrot.slane %v503_v39, 2  ;;  %v539_v50 = vadd.f32 %v538_v41, %v537_v31  ;;  %v547_v51 = vrot.slane %v546_v42, 4  ;;  %v555_v54 = vadd.f32 %v554_v46, %v553_v38 }
  0x1b   : > { %v522_v49 = vrot.slane %v521_v40, 2  ;;  %v514_v52 = vadd.f32 %v513_v44, %v512_v35  ;;  %v531_v53 = vrot.slane %v530_v45, 2  ;;  %v581_v55 = vsel %vm498_vm0, %v493_v43, 0.0 }
  0x1c   : > { %v505_v56 = vadd.f32 %v504_v48, %v503_v39  ;;  %v540_v58 = vrot.slane %v539_v50, 2  ;;  %v548_v59 = vadd.f32 %v547_v51, %v546_v42  ;;  %v556_v62 = vrot.slane %v555_v54, 4 }
  0x1d   : > { %v523_v57 = vadd.f32 %v522_v49, %v521_v40  ;;  %v515_v60 = vrot.slane %v514_v52, 1  ;;  %v532_v61 = vadd.f32 %v531_v53, %v530_v45  ;;  %v582_v63 = vadd.f32 %v581_v55, %v580_v47 }
  0x1e   : > { %v506_v0 = vrot.slane %v505_v56, 1  ;;  %v541_v2 = vadd.f32 %v540_v58, %v539_v50  ;;  %v549_v3 = vrot.slane %v548_v59, 2  ;;  %v557_v7 = vadd.f32 %v556_v62, %v555_v54  ;;  %v717_v58 = vld [vmem:[%s2256_s3] sm:$0xff] }
  0x1f   : > { %v524_v1 = vrot.slane %v523_v57, 1  ;;  %v516_v5 = vadd.f32 %v515_v60, %v514_v52  ;;  %v533_v6 = vrot.slane %v532_v61, 1  ;;  %v583_v8 = vrot.slane %v582_v63, 4 }
  0x20   : > { %v507_v11 = vadd.f32 %v506_v0, %v505_v56  ;;  %v542_v12 = vrot.slane %v541_v2, 1  ;;  %v550_v13 = vadd.f32 %v549_v3, %v548_v59  ;;  %v558_v16 = vrot.slane %v557_v7, 2  ;;  %v718_v59 = vld [vmem:[%s2256_s3 + $0x8] sm:$0xff] }
  0x21   : > { %615 = vperm.xlu0 %1844, %v516_v5   ;;  %v525_v15 = vadd.f32 %v524_v1, %v523_v57  ;;  %v584_v17 = vadd.f32 %v583_v8, %v582_v63  ;;  %v562_v18 = vsel %vm498_vm0, %v488_v4, 0.0  ;;  %v534_v21 = vadd.f32 %v533_v6, %v532_v61  ;;  %v719_v5 = vld [vmem:[%s2256_s3 + $0x10] sm:$0xff]  ;;  %v720_v6 = vld [vmem:[%s2256_s3 + $0x18] sm:$0xff] }
  0x22   : > { %610 = vperm.xlu1 %1845, %v507_v11   ;;  %v551_v22 = vrot.slane %v550_v13, 1  ;;  %v563_v23 = vsel %vm498_vm0, %v489_v9, 0.0  ;;  %v589_v24 = vsel %vm498_vm0, %v494_v10, 0.0  ;;  %v559_v25 = vadd.f32 %v558_v16, %v557_v7  ;;  %v721_v11 = vld [vmem:[%s2256_s3 + $0x20] sm:$0xff] }
  0x23   : > { %v585_v26 = vrot.slane %v584_v17, 2  ;;  %v564_v27 = vadd.f32 %v563_v23, %v562_v18  ;;  %v590_v28 = vsel %vm498_vm0, %v495_v14, 0.0  ;;  %v543_v31 = vadd.f32 %v542_v12, %v541_v2  ;;  %v722_v12 = vld [vmem:[%s2256_s3 + $0x28] sm:$0xff]  ;;  %v723_v14 = vld [vmem:[%s2256_s3 + $0x30] sm:$0xff]  ;;  %v855_v23 = vld [vmem:[%s2258_s5 + $0x20] sm:$0xff] }
  0x24   : > { %v591_v32 = vadd.f32 %v590_v28, %v589_v24  ;;  %v571_v33 = vsel %vm498_vm0, %v490_v19, 0.0  ;;  %v572_v34 = vsel %vm498_vm0, %v491_v20, 0.0  ;;  %v560_v35 = vrot.slane %v559_v25, 1  ;;  %v852_v18 = vld [vmem:[%s2258_s5 + $0x8] sm:$0xff]  ;;  %v853_v19 = vld [vmem:[%s2258_s5 + $0x10] sm:$0xff] }
  0x25   : > { %620 = vperm.xlu0 %1844, %v525_v15   ;;  %v586_v36 = vadd.f32 %v585_v26, %v584_v17  ;;  %v565_v37 = vrot.slane %v564_v27, 4  ;;  %v573_v38 = vadd.f32 %v572_v34, %v571_v33  ;;  %v552_v39 = vadd.f32 %v551_v22, %v550_v13  ;;  %v724_v15 = vld [vmem:[%s2256_s3 + $0x38] sm:$0xff]  ;;  %v851_v17 = vld [vmem:[%s2258_s5] sm:$0xff]  ;;  %v856_v24 = vld [vmem:[%s2258_s5 + $0x28] sm:$0xff] }
  0x26   : > { %625 = vperm.xlu1 %1845, %v534_v21   ;;  %v592_v40 = vrot.slane %v591_v32, 4  ;;  %v598_v41 = vsel %vm498_vm0, %v496_v29, 0.0  ;;  %v599_v42 = vsel %vm498_vm0, %v497_v30, 0.0  ;;  %v561_v48 = vadd.f32 %v560_v35, %v559_v25  ;;  %v854_v21 = vld [vmem:[%s2258_s5 + $0x18] sm:$0xff]  ;;  %v1499_v26 = vld [vmem:[%s2254_s1] ss:$0 sm:$0xff] }
  0x27   : > { %v587_v43 = vrot.slane %v586_v36, 1  ;;  %v566_v44 = vadd.f32 %v565_v37, %v564_v27  ;;  %v574_v45 = vrot.slane %v573_v38, 4  ;;  %v600_v47 = vadd.f32 %v599_v42, %v598_v41  ;;  %v2061_v27 = vld [vmem:[%s2255_s2] ss:$0 sm:$0xff] }
  0x28   : > { %v593_v46 = vadd.f32 %v592_v40, %v591_v32  ;;  %v1715_v62 = vpack.c.bf16 %v718_v59, %v717_v58  ;;  %v1719_v8 = vpack.c.bf16 %v720_v6, %v719_v5  ;;  %v1723_v13 = vpack.c.bf16 %v722_v12, %v721_v11 }
  0x29   : > { %630 = vperm.xlu0 %1844, %v543_v31   ;;  %v567_v49 = vrot.slane %v566_v44, 2  ;;  %v575_v50 = vadd.f32 %v574_v45, %v573_v38  ;;  %v588_v51 = vadd.f32 %v587_v43, %v586_v36  ;;  %v601_v53 = vrot.slane %v600_v47, 4 }
  0x2a   : > { %635 = vperm.xlu1 %1845, %v552_v39   ;;  %v594_v52 = vrot.slane %v593_v46, 2  ;;  %1716 = vmatprep.subr.bf16.mxu0 %v1715_v62  ;;  %v1727_v16 = vpack.c.bf16 %v724_v15, %v723_v14  ;;  %v1731_v20 = vpack.c.bf16 %v852_v18, %v851_v17  ;;  %v1735_v22 = vpack.c.bf16 %v854_v21, %v853_v19 }
  0x2b   : > { %v568_v54 = vadd.f32 %v567_v49, %v566_v44  ;;  %v576_v55 = vrot.slane %v575_v50, 2  ;;  %v602_v57 = vadd.f32 %v601_v53, %v600_v47  ;;  %1718 = vmatpush3.bf16.msra.mxu0 %v1715_v62  ;;  %v1739_v25 = vpack.c.bf16 %v856_v24, %v855_v23 }
  0x2c   : > { %v595_v56 = vadd.f32 %v594_v52, %v593_v46  ;;  %1720 = vmatprep.subr.bf16.mxu0 %v1719_v8  ;;  %1732 = vmatprep.subr.bf16.mxu1 %v1731_v20 }
  0x2d   : > { %640 = vperm.xlu0 %1844, %v561_v48   ;;  %v569_v60 = vrot.slane %v568_v54, 1  ;;  %v577_v61 = vadd.f32 %v576_v55, %v575_v50  ;;  %v603_v0 = vrot.slane %v602_v57, 2  ;;  %1734 = vmatpush3.bf16.msra.mxu1 %v1731_v20 }
  0x2e   : > { %655 = vperm.xlu1 %1845, %v588_v51   ;;  %v596_v63 = vrot.slane %v595_v56, 1  ;;  %1736 = vmatprep.subr.bf16.mxu1 %v1735_v22 }
  0x2f   : > { %v570_v1 = vadd.f32 %v569_v60, %v568_v54  ;;  %v578_v2 = vrot.slane %v577_v61, 1  ;;  %v604_v4 = vadd.f32 %v603_v0, %v602_v57  ;;  %1722 = vmatpush3.bf16.msra.mxu0 %v1719_v8 }
  0x30   : > { %v597_v3 = vadd.f32 %v596_v63, %v595_v56  ;;  %1724 = vmatprep.subr.bf16.mxu0 %v1723_v13 }
  0x31   : > { %645 = vperm.xlu0 %1844, %v570_v1   ;;  %v579_v7 = vadd.f32 %v578_v2, %v577_v61  ;;  %v605_v9 = vrot.slane %v604_v4, 1  ;;  %1738 = vmatpush3.bf16.msra.mxu1 %v1735_v22 }
  0x32   : > { %660 = vperm.xlu1 %1845, %v597_v3   ;;  %1740 = vmatprep.subr.bf16.mxu1 %v1739_v25 }
  0x33   : > { %v606_v10 = vadd.f32 %v605_v9, %v604_v4  ;;  %1726 = vmatpush3.bf16.msra.mxu0 %v1723_v13 }
  0x34   : > { %1728 = vmatprep.subr.bf16.mxu0 %v1727_v16 }
  0x35   : > { %650 = vperm.xlu0 %1844, %v579_v7   ;;  %1742 = vmatpush3.bf16.msra.mxu1 %v1739_v25 }
  0x36   : > { %665 = vperm.xlu1 %1845, %v606_v10  }
  0x37   : > { %1730 = vmatpush3.bf16.msra.mxu0 %v1727_v16 }
  0xa0   : > { %v616_v28 = vpop.permute.xlu0 %615 }
  0xa1   : > { %v675_v29 = vmul.f32 %v1499_v26, %v616_v28  ;;  %v611_v30 = vpop.permute.xlu1 %610 }
  0xa2   : > { %v674_v33 = vmul.f32 %v1499_v26, %v611_v30 }
  0xa3   : > { %v694_v31 = vadd.f32 %v2061_v27, %v675_v29 }
  0xa4   : > { %v621_v32 = vpop.permute.xlu0 %620  ;;  %v693_v41 = vadd.f32 %v2061_v27, %v674_v33  ;;  %v858_v33 = vld [vmem:[%s2258_s5 + $0x38] sm:$0xff] }
  0xa5   : > { %v676_v34 = vmul.f32 %v1499_v26, %v621_v32  ;;  %v626_v35 = vpop.permute.xlu1 %625  ;;  %v706_v37 = vmax.f32 %v694_v31, 0.0 }
  0xa6   : > { %v677_v36 = vmul.f32 %v1499_v26, %v626_v35  ;;  %v705_v52 = vmax.f32 %v693_v41, 0.0  ;;  %v1501_v35 = vld [vmem:[%s2257_s4] ss:$0 sm:$0xff] }
  0xa7   : > { %v695_v38 = vadd.f32 %v2061_v27, %v676_v34  ;;  %v744_v46 = vrot.slane %v706_v37, 7  ;;  %v2097_v41 = vld [vmem:[%s2259_s6] ss:$0 sm:$0xff] }
  0xa8   : > { %v696_v39 = vadd.f32 %v2061_v27, %v677_v36  ;;  %v631_v40 = vpop.permute.xlu0 %630 }
  0xa9   : > { %v707_v42 = vmax.f32 %v695_v38, 0.0  ;;  %v678_v43 = vmul.f32 %v1499_v26, %v631_v40  ;;  %v636_v44 = vpop.permute.xlu1 %635  ;;  %v746_v57 = vsel %vm745_vm1, %v744_v46, %v705_v52  ;;  %v1865_v40 = vmov 0.0  }
  0xaa   : > { %v679_v45 = vmul.f32 %v1499_v26, %v636_v44  ;;  %v708_v47 = vmax.f32 %v696_v39, 0.0  ;;  %1010 = vst [vmem:[#allocation3] sm:$0xff] %v1865_v40  ;;  %1011 = vst [vmem:[#allocation3 + $0x8] sm:$0xff] %v1865_v40  ;;  %v953_v44 = vlaneseq }
  0xab   : > { %v697_v48 = vadd.f32 %v2061_v27, %v678_v43  ;;  %v747_v49 = vrot.slane %v707_v42, 6  ;;  %1012 = vst [vmem:[#allocation3 + $0x10] sm:$0xff] %v1865_v40  ;;  %1013 = vst [vmem:[#allocation3 + $0x18] sm:$0xff] %v1865_v40  ;;  %v1866_v42 = vmov 1983009808  }
  0xac   : > { %v698_v50 = vadd.f32 %v2061_v27, %v679_v45  ;;  %v641_v51 = vpop.permute.xlu0 %640  ;;  %v750_v58 = vrot.slane %v708_v47, 5  ;;  %v951_v43 = vunpack.c.l.s4 %v1866_v42  ;;  %v2099_v46 = vshrl.u32 %v953_v44, 7  ;;  %v1504_v47 = vld [vmem:[%s2260_s7] ss:$0 sm:$0xff] }
  0xad   : > { %v709_v53 = vmax.f32 %v697_v48, 0.0  ;;  %v680_v54 = vmul.f32 %v1499_v26, %v641_v51  ;;  %v656_v55 = vpop.permute.xlu1 %655  ;;  %v749_v61 = vsel %vm748_vm2, %v747_v49, %v746_v57 }
  0xae   : > { %v683_v56 = vmul.f32 %v1499_v26, %v656_v55  ;;  %v710_v59 = vmax.f32 %v698_v50, 0.0  ;;  %v752_v5 = vsel %vm751_vm3, %v750_v58, %v749_v61  ;;  %v952_v45 = vunpack.c.0.s8 %v951_v43 }
  0xaf   : > { %v699_v60 = vadd.f32 %v2061_v27, %v680_v54  ;;  %v753_v62 = vrot.slane %v709_v53, 4 }
  0xb0   : > { %v646_v63 = vpop.permute.xlu0 %645  ;;  %v702_v1 = vadd.f32 %v2061_v27, %v683_v56  ;;  %v756_v6 = vrot.slane %v710_v59, 3  ;;  %v955_v49 = vsub.s32 %v952_v45, %v2099_v46 }
  0xb1   : > { %v711_v0 = vmax.f32 %v699_v60, 0.0  ;;  %v681_v2 = vmul.f32 %v1499_v26, %v646_v63  ;;  %v661_v3 = vpop.permute.xlu1 %660  ;;  %v755_v11 = vsel %vm754_vm4, %v753_v62, %v752_v5 }
  0xb2   : > { %v684_v4 = vmul.f32 %v1499_v26, %v661_v3  ;;  %v714_v12 = vmax.f32 %v702_v1, 0.0  ;;  %v758_v20 = vsel %vm757_vm5, %v756_v6, %v755_v11 }
  0xb3   : > { %v700_v7 = vadd.f32 %v2061_v27, %v681_v2  ;;  %v759_v8 = vrot.slane %v711_v0, 2 }
  0xb4   : > { %v703_v9 = vadd.f32 %v2061_v27, %v684_v4  ;;  %v651_v10 = vpop.permute.xlu0 %650  ;;  %v765_v23 = vrot.slane %v714_v12, 7 }
  0xb5   : > { %v712_v13 = vmax.f32 %v700_v7, 0.0  ;;  %v682_v14 = vmul.f32 %v1499_v26, %v651_v10  ;;  %v666_v15 = vpop.permute.xlu1 %665  ;;  %v761_v22 = vsel %vm760_vm6, %v759_v8, %v758_v20 }
  0xb6   : > { %v715_v16 = vmax.f32 %v703_v9, 0.0  ;;  %v685_v17 = vmul.f32 %v1499_v26, %v666_v15 }
  0xb7   : > { %v762_v18 = vrot.slane %v712_v13, 1  ;;  %v701_v19 = vadd.f32 %v2061_v27, %v682_v14 }
  0xb8   : > { %v704_v21 = vadd.f32 %v2061_v27, %v685_v17  ;;  %v767_v28 = vrot.slane %v715_v16, 6  ;;  %v857_v27 = vld [vmem:[%s2258_s5 + $0x30] sm:$0xff] }
  0xb9   : > { %v713_v24 = vmax.f32 %v701_v19, 0.0  ;;  %v764_v25 = vsel %vm763_vm7, %v762_v18, %v761_v22  ;;  %v1743_v34 = vpack.c.bf16 %v858_v33, %v857_v27 }
  0xba   : > { %v716_v29 = vmax.f32 %v704_v21, 0.0  ;;  %1603 = vmatprep.mubr.msk.f32.mxu0 %vm771_vm8, %v764_v25 }
  0xbb   : > { %v766_v30 = vsel %vm745_vm1, %v765_v23, %v713_v24  ;;  %1744 = vmatprep.subr.bf16.mxu1 %v1743_v34 }
  0xbc   : > { %v769_v31 = vrot.slane %v716_v29, 5  ;;  %v768_v26 = vsel %vm748_vm2, %v767_v28, %v766_v30  ;;  %1746 = vmatpush3.bf16.msra.mxu1 %v1743_v34 }
  0xbe   : > { %v770_v32 = vsel %vm751_vm3, %v769_v31, %v768_v26 }
  0xbf   : > { %1604 = vmatmul.mubr.msk.f32.vlgmr.msra.gmra.mrb[0].mxu0 %vm771_vm8, %v770_v32 }
 0x192   : > { %v1605_v36 = vpop.f32.mrb[0].mxu0 }
 0x193   : > { %v842_v37 = vpop.f32.mrb[1].mxu0  ;;  %v848_v39 = vadd.f32 %v1605_v36, %v1501_v35 }
 0x194   : > { %v843_v38 = vadd.f32 %v1501_v35, %v842_v37 }
 0x196   : > { %1622 = vmatprep.mubr.msk.f32.mxu1 %vm771_vm8, %v843_v38 }
 0x197   : > { %1623 = vmatmul.mubr.msk.f32.vlgmr.msra.gmra.mrb[0].mxu1 %vm771_vm8, %v848_v39 }
 0x26a   : > { %v1624_v48 = vpop.f32.mrb[0].mxu1 }
 0x26b   : > { %v944_v50 = vadd.f32 %v1624_v48, %v1504_v47  ;;  %v938_v51 = vpop.f32.mrb[1].mxu1 }
 0x26c   : > { %v939_v52 = vadd.f32 %v1504_v47, %v938_v51 }
 0x26d   : > { %v972_v53 = vrot.slane %v944_v50, %v955_v49 }
 0x26e   : > { %v949_v54 = vcombine.high %v939_v52, %v939_v52  ;;  %v956_v55 = vrot.slane %v939_v52, %v955_v49 }
 0x26f   : > { %v973_v58 = vcombine.high %v972_v53, %v972_v53 }
 0x270   : > { %v963_v56 = vrot.slane %v949_v54, %v955_v49  ;;  %v964_v57 = vcombine.high %v956_v55, %v956_v55 }
 0x271   : > { %v1004_v0 = vrot.slane %v973_v58, %v955_v49 }
 0x272   : > { %v965_v59 = vcombine.high %v963_v56, %v963_v56  ;;  %v974_v60 = vcombine.low %v956_v55, %v964_v57  ;;  %v988_v62 = vrot.slane %v963_v56, %v955_v49 }
 0x274   : > { %v981_v61 = vrot.slane %v974_v60, %v955_v49  ;;  %v990_v63 = vcombine.low %v965_v59, %v972_v53 }
 0x276   : > { %v989_v1 = vcombine.low %v981_v61, %v988_v62  ;;  %v997_v2 = vrot.slane %v990_v63, %v955_v49 }
 0x278   : > { %v1005_v3 = vcombine.low %v997_v2, %v1004_v0  ;;  %1008 = vst [vmem:[#allocation2] sm:$0x3f] %v989_v1 }
 0x27a   : > { %1009 = vst [vmem:[#allocation2 + $0x8] sm:$0x3f] %v1005_v3 }
 0x27b LB: >> { %v1867_v4 = vmov 0   ;;  %s1507_s15 = sshll.u32 %s1862_s27, 4  ;;  %s1021_s17 = scalar_lea.vmem [#allocation2], %s1862_s27  ;;  %v1032_v17 = vld [vmem:[#allocation3 + $0x10] sm:$0xff]  ;;  %v1030_v18 = vld [vmem:[#allocation3] sm:$0xff]  ;;  %v1033_v31 = vld [vmem:[#allocation3 + $0x18] sm:$0xff]  ;;  %s1862_s27 = sphi %s2105_s27, %s1020_s27  }
 0x27c   : >> { %1847 = vset.pattern.permute.xlu1 %v1867_v4  ;;  %1846 = vset.pattern.permute.xlu0 %v1867_v4  ;;  %s1025_s16 = scalar_lea.vmem %s1956_s19, %s1507_s15  ;;  %v1031_v26 = vld [vmem:[#allocation3 + $0x8] sm:$0xff]  ;;  %s1020_s27 = sadd.s32 1, %s1862_s27  }
 0x27d   : >> { %v1028_v5 = vld [vmem:[%s1025_s16 + $0x60] sm:$0xff]  ;;  %v1029_v7 = vld [vmem:[%s1025_s16 + $0x68] sm:$0xff]  ;;  %p1017_p5 = scmp.ge.s32.totalorder %s1020_s27, 6  }
 0x27e   : >> { %v1026_v6 = vld [vmem:[%s1025_s16] sm:$0xff]  ;;  %1046 = vperm.xlu1 %1847, %v1028_v5   ;;  %v1027_v8 = vld [vmem:[%s1025_s16 + $0x8] sm:$0xff]  ;;  %v1094_v37 = vld [vmem:[%s2261_s8 + $0x10] sm:$0xff] (%p1017_p5)  ;;  %vm1324_vm9 = vcmask (%p1017_p5), 261120  }
 0x27f   : >> { %1036 = vperm.xlu0 %1846, %v1026_v6   ;;  %v1092_v35 = vld [vmem:[%s2261_s8] sm:$0xff] (%p1017_p5)  ;;  %v1093_v36 = vld [vmem:[%s2261_s8 + $0x8] sm:$0xff] (%p1017_p5)  ;;  %v1095_v39 = vld [vmem:[%s2261_s8 + $0x18] sm:$0xff] (%p1017_p5) }
 0x280   : > { %v1747_v38 = vpack.c.bf16 (%p1017_p5), %v1093_v36, %v1092_v35  ;;  %v1751_v40 = vpack.c.bf16 (%p1017_p5), %v1095_v39, %v1094_v37  ;;  %v1097_v42 = vld [vmem:[%s2261_s8 + $0x28] sm:$0xff] (%p1017_p5)  ;;  %v1098_v45 = vld [vmem:[%s2261_s8 + $0x30] sm:$0xff] (%p1017_p5)  ;;  %v1099_v47 = vld [vmem:[%s2261_s8 + $0x38] sm:$0xff] (%p1017_p5) }
 0x281   : >> { %v1510_v10 = vld [vmem:[%s1021_s17 + $0x8] ss:$0 sm:$0xff]  ;;  %v1509_v12 = vld [vmem:[%s1021_s17] ss:$0 sm:$0xff]  ;;  %v1203_v50 = vld [vmem:[%s2263_s10 + $0x10] sm:$0xff] (%p1017_p5)  ;;  %v1759_v54 = vpack.c.bf16 (%p1017_p5), %v1099_v47, %v1098_v45 }
 0x282   : >> { %1051 = vperm.xlu1 %1847, %v1029_v7   ;;  %1748 = vmatprep.subr.bf16.mxu0 (%p1017_p5), %v1747_v38  ;;  %v1201_v48 = vld [vmem:[%s2263_s10] sm:$0xff] (%p1017_p5)  ;;  %v1202_v49 = vld [vmem:[%s2263_s10 + $0x8] sm:$0xff] (%p1017_p5)  ;;  %v1204_v51 = vld [vmem:[%s2263_s10 + $0x18] sm:$0xff] (%p1017_p5) }
 0x283   : >> { %1041 = vperm.xlu0 %1846, %v1027_v8   ;;  %1750 = vmatpush3.bf16.msra.mxu0 (%p1017_p5), %v1747_v38  ;;  %v1779_v52 = vpack.c.bf16 (%p1017_p5), %v1202_v49, %v1201_v48  ;;  %v1783_v53 = vpack.c.bf16 (%p1017_p5), %v1204_v51, %v1203_v50  ;;  %v1205_v55 = vld [vmem:[%s2263_s10 + $0x20] sm:$0xff] (%p1017_p5)  ;;  %v1206_v56 = vld [vmem:[%s2263_s10 + $0x28] sm:$0xff] (%p1017_p5)  ;;  %v1207_v61 = vld [vmem:[%s2263_s10 + $0x30] sm:$0xff] (%p1017_p5) }
 0x284   : > { %1752 = vmatprep.subr.bf16.mxu0 (%p1017_p5), %v1751_v40  ;;  %v1100_v57 = vld [vmem:[%s2261_s8 + $0x40] sm:$0xff] (%p1017_p5)  ;;  %v1101_v58 = vld [vmem:[%s2261_s8 + $0x48] sm:$0xff] (%p1017_p5)  ;;  %v1787_v59 = vpack.c.bf16 (%p1017_p5), %v1206_v56, %v1205_v55  ;;  %v1208_v62 = vld [vmem:[%s2263_s10 + $0x38] sm:$0xff] (%p1017_p5) }
 0x285   : > { %1780 = vmatprep.subr.bf16.mxu1 (%p1017_p5), %v1779_v52  ;;  %v1763_v60 = vpack.c.bf16 (%p1017_p5), %v1101_v58, %v1100_v57  ;;  %v1102_v63 = vld [vmem:[%s2261_s8 + $0x50] sm:$0xff] (%p1017_p5)  ;;  %v1103_v0 = vld [vmem:[%s2261_s8 + $0x58] sm:$0xff] (%p1017_p5)  ;;  %v1791_v1 = vpack.c.bf16 (%p1017_p5), %v1208_v62, %v1207_v61  ;;  %v1209_v3 = vld [vmem:[%s2263_s10 + $0x40] sm:$0xff] (%p1017_p5) }
 0x286   : > { %1782 = vmatpush3.bf16.msra.mxu1 (%p1017_p5), %v1779_v52  ;;  %v1767_v2 = vpack.c.bf16 (%p1017_p5), %v1103_v0, %v1102_v63  ;;  %v1210_v4 = vld [vmem:[%s2263_s10 + $0x48] sm:$0xff] (%p1017_p5)  ;;  %v1104_v5 = vld [vmem:[%s2261_s8 + $0x60] sm:$0xff] (%p1017_p5)  ;;  %v1315_v39 = vld [vmem:[%s2265_s12 + $0x10] sm:$0xff] (%p1017_p5) }
 0x287   : > { %1754 = vmatpush3.bf16.msra.mxu0 (%p1017_p5), %v1751_v40  ;;  %1784 = vmatprep.subr.bf16.mxu1 (%p1017_p5), %v1783_v53  ;;  %v1105_v6 = vld [vmem:[%s2261_s8 + $0x68] sm:$0xff] (%p1017_p5)  ;;  %v1795_v7 = vpack.c.bf16 (%p1017_p5), %v1210_v4, %v1209_v3  ;;  %v1512_v55 = vld [vmem:[%s2266_s13] ss:$0 sm:$0xff] (%p1017_p5) }
 0x288   : > { %v1771_v8 = vpack.c.bf16 (%p1017_p5), %v1105_v6, %v1104_v5 }
 0x28a   : > { %1786 = vmatpush3.bf16.msra.mxu1 (%p1017_p5), %v1783_v53 }
 0x28b   : > { %1788 = vmatprep.subr.bf16.mxu1 (%p1017_p5), %v1787_v59 }
 0x28e   : > { %1790 = vmatpush3.bf16.msra.mxu1 (%p1017_p5), %v1787_v59 }
 0x28f   : > { %1792 = vmatprep.subr.bf16.mxu1 (%p1017_p5), %v1791_v1 }
 0x292   : > { %1794 = vmatpush3.bf16.msra.mxu1 (%p1017_p5), %v1791_v1 }
 0x293   : > { %1796 = vmatprep.subr.bf16.mxu1 (%p1017_p5), %v1795_v7 }
 0x296   : > { %1798 = vmatpush3.bf16.msra.mxu1 (%p1017_p5), %v1795_v7 }
 0x2fd   : >> { %v1047_v9 = vpop.permute.xlu1 %1046 }
 0x2fe   : >> { %v1037_v11 = vpop.permute.xlu0 %1036  ;;  %v1062_v13 = vmul.f32 %v2097_v41, %v1047_v9  ;;  %v1211_v9 = vld [vmem:[%s2263_s10 + $0x50] sm:$0xff] (%p1017_p5) }
 0x2ff   : >> { %v1060_v14 = vmul.f32 %v2097_v41, %v1037_v11  ;;  %v1106_v11 = vld [vmem:[%s2261_s8 + $0x70] sm:$0xff] (%p1017_p5) }
 0x300   : >> { %v1074_v15 = vadd.f32 %v1510_v10, %v1062_v13 }
 0x301   : >> { %v1072_v16 = vadd.f32 %v1509_v12, %v1060_v14  ;;  %v1052_v19 = vpop.permute.xlu1 %1051 }
 0x302   : >> { %v1042_v20 = vpop.permute.xlu0 %1041  ;;  %v1078_v21 = vmax.f32 %v1074_v15, 0.0  ;;  %v1063_v23 = vmul.f32 %v2097_v41, %v1052_v19  ;;  %v1213_v15 = vld [vmem:[%s2263_s10 + $0x60] sm:$0xff] (%p1017_p5) }
 0x303   : >> { %v1076_v22 = vmax.f32 %v1072_v16, 0.0  ;;  %v1061_v24 = vmul.f32 %v2097_v41, %v1042_v20  ;;  %v1096_v41 = vld [vmem:[%s2261_s8 + $0x20] sm:$0xff] (%p1017_p5)  ;;  %v1214_v16 = vld [vmem:[%s2263_s10 + $0x68] sm:$0xff] (%p1017_p5) }
 0x304   : >> { %v1082_v25 = vadd.f32 %v1078_v21, %v1032_v17  ;;  %v1075_v29 = vadd.f32 %v1510_v10, %v1063_v23  ;;  %v1755_v43 = vpack.c.bf16 (%p1017_p5), %v1097_v42, %v1096_v41  ;;  %v1212_v10 = vld [vmem:[%s2263_s10 + $0x58] sm:$0xff] (%p1017_p5)  ;;  %v1803_v17 = vpack.c.bf16 (%p1017_p5), %v1214_v16, %v1213_v15  ;;  %v1215_v21 = vld [vmem:[%s2263_s10 + $0x70] sm:$0xff] (%p1017_p5)  ;;  %v1511_v41 = vld [vmem:[%s2264_s11] ss:$0 sm:$0xff] (%p1017_p5) }
 0x305   : >> { %v1080_v28 = vadd.f32 %v1076_v22, %v1030_v18  ;;  %v1073_v30 = vadd.f32 %v1509_v12, %v1061_v24  ;;  %v1107_v12 = vld [vmem:[%s2261_s8 + $0x78] sm:$0xff] (%p1017_p5)  ;;  %v1799_v13 = vpack.c.bf16 (%p1017_p5), %v1212_v10, %v1211_v9  ;;  %v1313_v24 = vld [vmem:[%s2265_s12] sm:$0xff] (%p1017_p5) }
 0x306   : >> { %1086 = vst [vmem:[#allocation3 + $0x10] sm:$0xff] %v1082_v25  ;;  %v1079_v32 = vmax.f32 %v1075_v29, 0.0  ;;  %1756 = vmatprep.subr.bf16.mxu0 (%p1017_p5), %v1755_v43  ;;  %v1775_v14 = vpack.c.bf16 (%p1017_p5), %v1107_v12, %v1106_v11  ;;  %v1216_v22 = vld [vmem:[%s2263_s10 + $0x78] sm:$0xff] (%p1017_p5)  ;;  %v1314_v25 = vld [vmem:[%s2265_s12 + $0x8] sm:$0xff] (%p1017_p5)  ;;  %v1108_v29 = vld [vmem:[%s2262_s9] sm:$0x1] (%p1017_p5) }
 0x307   : >> { %1084 = vst [vmem:[#allocation3] sm:$0xff] %v1080_v28  ;;  %v1077_v27 = vmax.f32 %v1073_v30, 0.0  ;;  %1758 = vmatpush3.bf16.msra.mxu0 (%p1017_p5), %v1755_v43  ;;  %1800 = vmatprep.subr.bf16.mxu1 (%p1017_p5), %v1799_v13  ;;  %v1807_v23 = vpack.c.bf16 (%p1017_p5), %v1216_v22, %v1215_v21  ;;  %v1811_v28 = vpack.c.bf16 (%p1017_p5), %v1314_v25, %v1313_v24  ;;  %v1109_v30 = vmul.f32 (%p1017_p5), 6.0, %v1108_v29 }
 0x308   : >> { %v1083_v33 = vadd.f32 %v1079_v32, %v1033_v31  ;;  %1760 = vmatprep.subr.bf16.mxu0 (%p1017_p5), %v1759_v54  ;;  %1802 = vmatpush3.bf16.msra.mxu1 (%p1017_p5), %v1799_v13  ;;  %v1113_v31 = vsub.s32 (%p1017_p5), 0, %v2099_v46  ;;  %v1316_v46 = vld [vmem:[%s2265_s12 + $0x18] sm:$0xff] (%p1017_p5) }
 0x309   : >> { %v1081_v34 = vadd.f32 %v1077_v27, %v1031_v26  ;;  %1804 = vmatprep.subr.bf16.mxu1 (%p1017_p5), %v1803_v17  ;;  %v1815_v40 = vpack.c.bf16 (%p1017_p5), %v1316_v46, %v1315_v39 }
 0x30a   : >> { %1087 = vst [vmem:[#allocation3 + $0x18] sm:$0xff] %v1083_v33  ;;  %v1114_v26 = vrot.slane (%p1017_p5), %v1109_v30, %v1113_v31 }
 0x30b   : >> { %1085 = vst [vmem:[#allocation3 + $0x8] sm:$0xff] %v1081_v34  ;;  %1019 = sbr.rel (!%p1017_p5) target bundleno = 635 (0x27b), region = 115  ;;  %1762 = vmatpush3.bf16.msra.mxu0 (%p1017_p5), %v1759_v54 }
 0x30c   : > { %1764 = vmatprep.subr.bf16.mxu0 (%p1017_p5), %v1763_v60  ;;  %1806 = vmatpush3.bf16.msra.mxu1 (%p1017_p5), %v1803_v17 }
 0x30d   : > { %v1090_v19 = vld [vmem:[#allocation3 + $0x10] sm:$0xff] (%p1017_p5)  ;;  %1808 = vmatprep.subr.bf16.mxu1 (%p1017_p5), %v1807_v23 }
 0x30e   : > { %v1088_v44 = vld [vmem:[#allocation3] sm:$0xff] (%p1017_p5) }
 0x30f   : > { %1657 = vmatprep.mubr.f32.mxu0 (%p1017_p5), %v1088_v44  ;;  %1766 = vmatpush3.bf16.msra.mxu0 (%p1017_p5), %v1763_v60 }
 0x310   : > { %1768 = vmatprep.subr.bf16.mxu0 (%p1017_p5), %v1767_v2  ;;  %1810 = vmatpush3.bf16.msra.mxu1 (%p1017_p5), %v1807_v23 }
 0x311   : > { %v1091_v20 = vld [vmem:[#allocation3 + $0x18] sm:$0xff] (%p1017_p5)  ;;  %1819 = vmatprep.subr.bf16.mxu1 (%p1017_p5), %v1811_v28 }
 0x312   : > { %v1089_v18 = vld [vmem:[#allocation3 + $0x8] sm:$0xff] }
 0x313   : > { %1770 = vmatpush3.bf16.msra.mxu0 %v1767_v2 }
 0x314   : > { %1772 = vmatprep.subr.bf16.mxu0 %v1771_v8 }
 0x317   : > { %1774 = vmatpush3.bf16.msra.mxu0 %v1771_v8 }
 0x318   : > { %1776 = vmatprep.subr.bf16.mxu0 %v1775_v14 }
 0x31b   : > { %1778 = vmatpush3.bf16.msra.mxu0 %v1775_v14 }
 0x31c   : > { %1812 = vmatprep.subr.bf16.mxu0 %v1811_v28 }
 0x31e   : > { %1658 = vmatmul.mubr.f32.vlgmr.msra.gmra.mrb[2].mxu0 %v1089_v18 }
 0x31f   : > { %1660 = vmatprep.mubr.f32.mxu0 %v1090_v19  ;;  %1814 = vmatpush3.bf16.msra.mxu0 %v1811_v28 }
 0x320   : > { %1816 = vmatprep.subr.bf16.mxu0 %v1815_v40 }
 0x322   : > { %1661 = vmatmul.mubr.f32.gmra.mrb[4].mxu0 %v1091_v20 }
 0x323   : > { %1818 = vmatpush3.bf16.msra.mxu0 %v1815_v40 }
 0x3f1   : > { %v1659_v32 = vpop.f32.mrb[2].mxu0 }
 0x3f2   : > { %v1182_v27 = vpop.f32.mrb[3].mxu0  ;;  %v1188_v34 = vadd.f32 %v1659_v32, %v1114_v26 }
 0x3f3   : > { %v1183_v33 = vadd.f32 %v1182_v27, %v1114_v26 }
 0x3f5   : > { %v1662_v35 = vpop.f32.mrb[4].mxu0  ;;  %1695 = vmatprep.mubr.f32.mxu1 %v1183_v33 }
 0x3f6   : > { %v1192_v36 = vpop.f32.mrb[5].mxu0  ;;  %1696 = vmatmul.mubr.f32.vlgmr.msra.gmra.mrb[2].mxu1 %v1188_v34  ;;  %v1198_v38 = vadd.f32 %v1662_v35, %v1114_v26 }
 0x3f7   : > { %v1193_v37 = vadd.f32 %v1192_v36, %v1114_v26  ;;  %1821 = vmatpush3.bf16.msra.mxu1 %v1811_v28 }
 0x3f8   : > { %1820 = vmatprep.subr.bf16.mxu1 %v1815_v40 }
 0x3f9   : > { %1698 = vmatprep.mubr.f32.mxu1 %v1193_v37 }
 0x3fa   : > { %1699 = vmatmul.mubr.f32.gmra.mrb[4].mxu1 %v1198_v38 }
 0x3fb   : > { %1822 = vmatpush3.bf16.msra.mxu1 %v1815_v40 }
 0x4c9   : > { %v1697_v42 = vpop.f32.mrb[2].mxu1 }
 0x4ca   : > { %v1296_v43 = vadd.f32 %v1697_v42, %v1511_v41  ;;  %v1290_v44 = vpop.f32.mrb[3].mxu1 }
 0x4cb   : > { %v1291_v45 = vadd.f32 %v1511_v41, %v1290_v44 }
 0x4cc   : > { %v1310_v49 = vmax.f32 %v1296_v43, 0.0 }
 0x4cd   : > { %v1309_v47 = vmax.f32 %v1291_v45, 0.0  ;;  %v1700_v48 = vpop.f32.mrb[4].mxu1 }
 0x4ce   : > { %v1306_v50 = vadd.f32 %v1700_v48, %v1511_v41  ;;  %v1300_v51 = vpop.f32.mrb[5].mxu1 }
 0x4cf   : > { %v1301_v52 = vadd.f32 %v1511_v41, %v1300_v51  ;;  %1709 = vmatprep.mubr.msk.f32.mxu0 %vm1324_vm9, %v1309_v47 }
 0x4d0   : > { %1710 = vmatmul.mubr.msk.f32.vlgmr.msra.gmra.mrb[6].mxu0 %vm1324_vm9, %v1310_v49  ;;  %v1312_v54 = vmax.f32 %v1306_v50, 0.0 }
 0x4d1   : > { %v1311_v53 = vmax.f32 %v1301_v52, 0.0 }
 0x4d3   : > { %1712 = vmatprep.mubr.msk.f32.mxu1 %vm1324_vm9, %v1311_v53 }
 0x4d4   : > { %1713 = vmatmul.mubr.msk.f32.vlgmr.msra.gmra.mrb[6].mxu1 %vm1324_vm9, %v1312_v54 }
 0x5a3   : > { %v1711_v56 = vpop.f32.mrb[6].mxu0 }
 0x5a4   : > { %v1403_v57 = vpop.f32.mrb[7].mxu0  ;;  %v1409_v59 = vadd.f32 %v1711_v56, %v1512_v55 }
 0x5a5   : > { %v1404_v58 = vadd.f32 %v1512_v55, %v1403_v57 }
 0x5a6   : > { %1423 = vst.msk [vmem:[%s2035_s26 + $0x8] sm:$0xff] %vm1324_vm9, %v1409_v59 }
 0x5a7   : > { %1422 = vst.msk [vmem:[%s2035_s26] sm:$0xff] %vm1324_vm9, %v1404_v58  ;;  %v1714_v60 = vpop.f32.mrb[6].mxu1 }
 0x5a8   : > { %v1413_v61 = vpop.f32.mrb[7].mxu1  ;;  %v1419_v63 = vadd.f32 %v1714_v60, %v1512_v55 }
 0x5a9   : > { %v1414_v62 = vadd.f32 %v1512_v55, %v1413_v61 }
 0x5aa   : > { %1425 = vst.msk [vmem:[%s2035_s26 + $0x18] sm:$0xff] %vm1324_vm9, %v1419_v63 }
 0x5ab   : > { %1424 = vst.msk [vmem:[%s2035_s26 + $0x10] sm:$0xff] %vm1324_vm9, %v1414_v62 }
 0x5ac PF: > { %s24_s29 = sadd.s32 1, %s1858_s29  }
 0x5ad   : > { %p21_p6 = scmp.ge.s32.totalorder %s24_s29, 4  }
 0x5af   :  { %23 = sbr.rel (!%p21_p6) target bundleno = 1 (0x1), region = 126 }

</bundles_post_ra>
